<compile_context>
chip_gen: v7x
topology: tpu7x:2x2x1
jax: 0.10.0
libtpu: 0.0.40
codegen_flags: <defaults>
</compile_context>

<pallas_src>
import math

import numpy as np
import jax
import jax.numpy as jnp
from jax import lax
from jax.experimental import pallas as pl
from jax.experimental.pallas import tpu as pltpu

# ---------------- constants (mirroring the PyTorch module-level globals) -----
NHEAD = 1
MULTI_STEP_NUM = 1
NLAYERS = 1
NX = 32          # spatial grid constant used only as the scale Nx/(2*pi)
D_MODEL = 32     # d_model (== n_head * d_head since d_head = d_model)
NTOKENS = 8      # sequence length (== ntokens in the PyTorch script)
BATCH = 2


# ---------------- parameter / mask construction (plain JAX glue, run once) ---
def generate_dspace(sz: int, a: int, b: int) -> jnp.ndarray:
    eye = jnp.eye(sz, dtype=jnp.float32)
    d = eye
    if a > 0:
        d = d + jnp.roll(eye, 1, axis=0)
    if a > 1:
        d = d + jnp.roll(eye, 2, axis=0)
    if a > 2:
        d = d + jnp.roll(eye, 3, axis=0)
    if b > 0:
        d = d + jnp.roll(eye, -1, axis=0)
    if b > 1:
        d = d + jnp.roll(eye, -2, axis=0)
    return d


def soft_max_mask(sz: int, num_step: int) -> jnp.ndarray:
    table = {1: [1.0], 2: [3 / 2, -1 / 2], 3: [23 / 12, -16 / 12, 5 / 12],
             4: [55 / 24, -59 / 24, 37 / 24, -9 / 24]}
    coeffs = table[num_step]
    k = np.zeros((sz, sz), dtype=np.float32)
    for iii in range(num_step):
        k += coeffs[iii] * np.diag(np.ones(sz - iii, dtype=np.float32), -iii)
    for iii in range(num_step - 1):
        cc = table[iii + 1]
        for jjj in range(iii + 1):
            k[iii, jjj] = cc[iii - jjj]
    return jnp.asarray(k)


def build_constants(params, seq_len: int, batch: int, d_model: int):
    """Build the fused lane-dense weight matrix and the block-diag mask ONCE.

    wcat_t = [ (Wq/sqrt(d_head)).T | Wk.T | A.T | B.T ]  of shape [D, 4D]=[32,128],
    so one x @ wcat_t produces q (pre-scaled), k, x@A.T and x@B.T in one MXU pass
    with a full 128-lane-wide result.

    mask_bd = blockdiag(mask, ..., mask)  of shape [B*S, B*S]: zeroes every
    cross-batch score entry before the row-sum, making the batched [B*S, D]
    formulation exactly equivalent to the per-batch one.
    """
    wq, wk, wv, wv2 = params["wq"], params["wk"], params["wv"], params["wv2"]
    scale = 1.0 / math.sqrt(d_model)   # d_head == d_model
    a_mat = (NX / (2.0 * np.pi)) * generate_dspace(d_model, 1, 1) * wv2
    b_mat = generate_dspace(d_model, 1, 0) * wv
    wcat_t = jnp.concatenate(
        [(scale * wq).T, wk.T, a_mat.T, b_mat.T], axis=1).astype(jnp.float32)
    mask = soft_max_mask(seq_len, MULTI_STEP_NUM).astype(jnp.float32)
    mask_bd = jnp.kron(jnp.eye(batch, dtype=jnp.float32), mask)   # [B*S, B*S]
    return wcat_t, mask_bd


# ---------------- Pallas kernel ----------------------------------------------
def _encoder_layer_kernel(x_ref,      # VMEM [B*S, D]   (batch-major rows)
                          dt_ref,     # VMEM [B*S, 1]   per-row deltat column
                          wcat_ref,   # VMEM [D, 4D]  = [scale*Wq | Wk | A | B]^T
                          mask_ref,   # VMEM [B*S, B*S] block-diag soft_max_mask
                          o_ref):     # VMEM [B*S, D]
    x = x_ref[...]                                     # [BS, D] whole-block load
    wcat = wcat_ref[...]                               # [D, 4D]
    mask = mask_ref[...]                               # [BS, BS]
    dt = dt_ref[...]                                   # [BS, 1]
    d = x.shape[1]

    # Single lane-dense projection for ALL batches: [BS, D] @ [D, 4D] -> [BS, 4D].
    proj = jnp.dot(x, wcat, preferred_element_type=jnp.float32)
    q = proj[:, 0 * d:1 * d]                           # already scaled by 1/sqrt(d_head)
    k = proj[:, 1 * d:2 * d]
    va = proj[:, 2 * d:3 * d]                          # x @ A.T
    vb = proj[:, 3 * d:4 * d]                          # x @ B.T

    # Value path: second-derivative-like term + nonlinear advection-like term.
    v = va + x * vb                                    # [BS, D]

    # Attention scores for all batches at once; cross-batch entries are killed by
    # the block-diagonal mask BEFORE the row-sum, so normalisation is unchanged.
    score = lax.dot_general(q, k, (((1,), (1,)), ((), ())),
                            preferred_element_type=jnp.float32)   # [BS, BS]
    score = mask * score

    # "softmax-free" normalisation: divide by row-sum over keys (+eps).
    denom = jnp.sum(score, axis=1, keepdims=True) + 1e-6
    prob = score * pl.reciprocal(denom, approx=False)  # EUP reciprocal, exact

    attn = jnp.dot(prob, v, preferred_element_type=jnp.float32)   # [BS, D]

    # Residual with per-row (per-batch) deltat: one broadcast FMA, one block store.
    o_ref[...] = (x + dt * attn).astype(o_ref.dtype)


@jax.jit
def transformer_model_forward(src_sbd, deltat, src_mask, wcat_t, mask_bd):
    """src_sbd: [S, B, D] (seq, batch, d_model), deltat: [B], src_mask: unused."""
    del src_mask  # passed in PyTorch but never used by the custom attention
    S, B, D = src_sbd.shape
    BS = B * S

    # Present the problem as one [B*S, D] slab (batch-major rows) and a matching
    # per-row deltat column — layout plumbing only, done in the jitted wrapper.
    x2d = jnp.transpose(src_sbd, (1, 0, 2)).reshape(BS, D).astype(jnp.float32)
    dt_col = jnp.repeat(deltat.astype(jnp.float32), S).reshape(BS, 1)

    out2d = pl.pallas_call(
        _encoder_layer_kernel,
        out_shape=jax.ShapeDtypeStruct((BS, D), jnp.float32),
        grid_spec=pl.GridSpec(
            grid=(1,),                                           # single invocation
            in_specs=[
                pl.BlockSpec((BS, D), lambda i: (0, 0)),         # x (whole slab)
                pl.BlockSpec((BS, 1), lambda i: (0, 0)),         # deltat column
                pl.BlockSpec((D, 4 * D), lambda i: (0, 0)),      # fused weights
                pl.BlockSpec((BS, BS), lambda i: (0, 0)),        # block-diag mask
            ],
            out_specs=pl.BlockSpec((BS, D), lambda i: (0, 0)),
        ),
        compiler_params=pltpu.CompilerParams(
            dimension_semantics=("arbitrary",)),
    )(x2d, dt_col, wcat_t, mask_bd)

    # Back to the PyTorch [S, B, D] layout.
    return jnp.transpose(out2d.reshape(B, S, D), (1, 0, 2))


# ---------------- pure-JAX reference for verification -------------------------
def reference_forward(src_sbd, deltat, params):
    x = jnp.transpose(src_sbd, (1, 0, 2)).astype(jnp.float32)   # [B, S, D]
    D = x.shape[-1]
    wq, wk, wv, wv2 = params["wq"], params["wk"], params["wv"], params["wv2"]
    a_mat = (NX / (2.0 * np.pi)) * generate_dspace(D, 1, 1) * wv2
    b_mat = generate_dspace(D, 1, 0) * wv
    mask = soft_max_mask(x.shape[1], MULTI_STEP_NUM)
    scale = 1.0 / math.sqrt(D)

    q = jnp.einsum("bsd,ed->bse", x, wq)
    k = jnp.einsum("bsd,ed->bse", x, wk)
    v = jnp.einsum("bsd,ed->bse", x, a_mat) + x * jnp.einsum("bsd,ed->bse", x, b_mat)
    score = jnp.einsum("bid,bjd->bij", q, k) * scale
    score = mask[None] * score
    prob = score / (jnp.sum(score, axis=2, keepdims=True) + 1e-6)
    attn = jnp.einsum("bij,bjd->bid", prob, v)
    out = x + deltat[:, None, None] * attn
    return jnp.transpose(out, (1, 0, 2))


# ---------------- main --------------------------------------------------------
if __name__ == "__main__":
    key = jax.random.PRNGKey(0)
    k_src, k_dt, k_wq, k_wk, k_wv, k_wv2 = jax.random.split(key, 6)

    S, B, D = NTOKENS, BATCH, D_MODEL
    src = jax.random.normal(k_src, (S, B, D), dtype=jnp.float32)       # [seq, batch, d_model]
    deltat = 0.01 * jax.random.uniform(k_dt, (B,), dtype=jnp.float32)  # per-batch time step
    src_mask = jnp.zeros((S, S), dtype=jnp.float32)                    # passed but unused

    # Deterministic parameter init (matches nn.init.normal_(std=0.01) shapes).
    params = {
        "wq":  0.01 * jax.random.normal(k_wq,  (D, D), dtype=jnp.float32),
        "wk":  0.01 * jax.random.normal(k_wk,  (D, D), dtype=jnp.float32),
        "wv":  0.01 * jax.random.normal(k_wv,  (D, D), dtype=jnp.float32),
        "wv2": 0.01 * jax.random.normal(k_wv2, (D, D), dtype=jnp.float32),
    }
    # TODO(synk): o_net / layer_norm / dropout / pos_encoder / decoder exist in
    # __init__ but are not used by this forward path, so they are not materialised.

    # Constants (fused weights + block-diag mask) are built once, outside the forward.
    wcat_t, mask_bd = build_constants(params, S, B, D)

    out = transformer_model_forward(src, deltat, src_mask, wcat_t, mask_bd)
    out = jax.block_until_ready(out)

    ref = reference_forward(src, deltat, params)
    assert out.shape == (S, B, D)
    np.testing.assert_allclose(np.asarray(out), np.asarray(ref), rtol=1e-5, atol=1e-5)

    print("KERNEL_OK")
</pallas_src>

<mosaic_0001>
module attributes {stable_mosaic.version = 11 : i64} {
  func.func @_encoder_layer_kernel(%arg0: i32, %arg1: memref<16x32xf32, #tpu.memory_space<vmem>>, %arg2: memref<16x1xf32, #tpu.memory_space<vmem>>, %arg3: memref<32x128xf32, #tpu.memory_space<vmem>>, %arg4: memref<16x16xf32, #tpu.memory_space<vmem>>, %arg5: memref<16x32xf32, #tpu.memory_space<vmem>>) attributes {dimension_semantics = [#tpu.dimension_semantics<arbitrary>], iteration_bounds = array<i64: 1>, scalar_prefetch = 0 : i64, scratch_operands = 0 : i64, tpu.core_type = #tpu.core_type<tc>, window_params = [{pipeline_mode = #tpu.pipeline_mode<synchronous>, transform_indices = @transform_0, window_bounds = array<i64: 16, 32>}, {pipeline_mode = #tpu.pipeline_mode<synchronous>, transform_indices = @transform_1, window_bounds = array<i64: 16, 1>}, {pipeline_mode = #tpu.pipeline_mode<synchronous>, transform_indices = @transform_2, window_bounds = array<i64: 32, 128>}, {pipeline_mode = #tpu.pipeline_mode<synchronous>, transform_indices = @transform_3, window_bounds = array<i64: 16, 16>}, {pipeline_mode = #tpu.pipeline_mode<synchronous>, transform_indices = @transform_4, window_bounds = array<i64: 16, 32>}]} {
    %c0 = arith.constant 0 : index
    %c0_0 = arith.constant 0 : index
    %0 = vector.load %arg1[%c0, %c0_0] : memref<16x32xf32, #tpu.memory_space<vmem>>, vector<16x32xf32>
    %c0_1 = arith.constant 0 : index
    %c0_2 = arith.constant 0 : index
    %1 = vector.load %arg3[%c0_1, %c0_2] : memref<32x128xf32, #tpu.memory_space<vmem>>, vector<32x128xf32>
    %c0_3 = arith.constant 0 : index
    %c0_4 = arith.constant 0 : index
    %2 = vector.load %arg4[%c0_3, %c0_4] : memref<16x16xf32, #tpu.memory_space<vmem>>, vector<16x16xf32>
    %c0_5 = arith.constant 0 : index
    %c0_6 = arith.constant 0 : index
    %3 = vector.load %arg2[%c0_5, %c0_6] : memref<16x1xf32, #tpu.memory_space<vmem>>, vector<16x1xf32>
    %cst = arith.constant dense<0.000000e+00> : vector<16x128xf32>
    %4 = tpu.matmul %0, %1, %cst {dimension_numbers = #tpu.dot_dimension_numbers<[1], [0], [0], [1], [0, 0, 1, 1], [], []>} : vector<16x32xf32>, vector<32x128xf32>, vector<16x128xf32> -> vector<16x128xf32>
    %5 = vector.extract_strided_slice %4 {offsets = [0, 0], sizes = [16, 32], strides = [1, 1]} : vector<16x128xf32> to vector<16x32xf32>
    %6 = vector.extract_strided_slice %4 {offsets = [0, 32], sizes = [16, 32], strides = [1, 1]} : vector<16x128xf32> to vector<16x32xf32>
    %7 = vector.extract_strided_slice %4 {offsets = [0, 64], sizes = [16, 32], strides = [1, 1]} : vector<16x128xf32> to vector<16x32xf32>
    %8 = vector.extract_strided_slice %4 {offsets = [0, 96], sizes = [16, 32], strides = [1, 1]} : vector<16x128xf32> to vector<16x32xf32>
    %9 = arith.mulf %0, %8 : vector<16x32xf32>
    %10 = arith.addf %7, %9 : vector<16x32xf32>
    %cst_7 = arith.constant dense<0.000000e+00> : vector<16x16xf32>
    %11 = tpu.matmul %5, %6, %cst_7 {dimension_numbers = #tpu.dot_dimension_numbers<[1], [1], [0], [0], [0, 0, 1, 0], [], []>} : vector<16x32xf32>, vector<16x32xf32>, vector<16x16xf32> -> vector<16x16xf32>
    %12 = arith.mulf %2, %11 : vector<16x16xf32>
    %cst_8 = arith.constant dense<0.000000e+00> : vector<16xf32>
    %13 = vector.multi_reduction <add>, %12, %cst_8 [1] : vector<16x16xf32> to vector<16xf32>
    %14 = vector.shape_cast %13 : vector<16xf32> to vector<16x1xf32>
    %cst_9 = arith.constant 9.99999997E-7 : f32
    %15 = vector.broadcast %cst_9 : f32 to vector<16x1xf32>
    %16 = arith.addf %14, %15 : vector<16x1xf32>
    %17 = tpu.reciprocal %16 : vector<16x1xf32> -> vector<16x1xf32>
    %18 = vector.broadcast %17 : vector<16x1xf32> to vector<16x16xf32>
    %19 = arith.mulf %12, %18 : vector<16x16xf32>
    %cst_10 = arith.constant dense<0.000000e+00> : vector<16x32xf32>
    %20 = tpu.matmul %19, %10, %cst_10 {dimension_numbers = #tpu.dot_dimension_numbers<[1], [0], [0], [1], [0, 0, 1, 1], [], []>} : vector<16x16xf32>, vector<16x32xf32>, vector<16x32xf32> -> vector<16x32xf32>
    %21 = vector.broadcast %3 : vector<16x1xf32> to vector<16x32xf32>
    %22 = arith.mulf %21, %20 : vector<16x32xf32>
    %23 = arith.addf %0, %22 : vector<16x32xf32>
    %c0_11 = arith.constant 0 : index
    %c0_12 = arith.constant 0 : index
    %24 = vector.load %arg5[%c0_11, %c0_12] : memref<16x32xf32, #tpu.memory_space<vmem>>, vector<16x32xf32>
    tpu.vector_store %arg5[%c0_11, %c0_12], %23 {strides = array<i32>} : memref<16x32xf32, #tpu.memory_space<vmem>>, vector<16x32xf32>,
    return
  }
  func.func @transform_0(%arg0: i32) -> (i32, i32) {
    %c0_i32 = arith.constant 0 : i32
    %c0_i32_0 = arith.constant 0 : i32
    %c0_i32_1 = arith.constant 0 : i32
    return %c0_i32, %c0_i32_0 : i32, i32
  }
  func.func @transform_1(%arg0: i32) -> (i32, i32) {
    %c0_i32 = arith.constant 0 : i32
    %c0_i32_0 = arith.constant 0 : i32
    %c0_i32_1 = arith.constant 0 : i32
    return %c0_i32, %c0_i32_0 : i32, i32
  }
  func.func @transform_2(%arg0: i32) -> (i32, i32) {
    %c0_i32 = arith.constant 0 : i32
    %c0_i32_0 = arith.constant 0 : i32
    %c0_i32_1 = arith.constant 0 : i32
    return %c0_i32, %c0_i32_0 : i32, i32
  }
  func.func @transform_3(%arg0: i32) -> (i32, i32) {
    %c0_i32 = arith.constant 0 : i32
    %c0_i32_0 = arith.constant 0 : i32
    %c0_i32_1 = arith.constant 0 : i32
    return %c0_i32, %c0_i32_0 : i32, i32
  }
  func.func @transform_4(%arg0: i32) -> (i32, i32) {
    %c0_i32 = arith.constant 0 : i32
    %c0_i32_0 = arith.constant 0 : i32
    %c0_i32_1 = arith.constant 0 : i32
    return %c0_i32, %c0_i32_0 : i32, i32
  }
}

</mosaic_0001>

<bundles_post_ra>
// kernel: transformer_model_forward.1
= control target key start
LH: loop header
LB: loop body
LE: loop exit
PB: predicated region body
PF: predicated region fallthrough
CT: control target
= control target key end

     0   :  { %vm27_vm0 = vcmask 261120   ;;  %s426_s27 = smov 96   ;;  %s427_s28 = smov 64   ;;  %vm218_vm2 = vcmask 130048   ;;  %v428_v32 = vmov 0   ;;  %s512_s2 = inlined_call_operand.vmem [shape: f32[32,128], index: 2, kind: input, shape index: {}]   ;;  %s513_s0 = inlined_call_operand.vmem [shape: f32[16,32], index: 0, kind: input, shape index: {}]   ;;  %s514_s3 = inlined_call_operand.vmem [shape: f32[16,16], index: 3, kind: input, shape index: {}]   ;;  %s515_s1 = inlined_call_operand.vmem [shape: f32[16,1], index: 1, kind: input, shape index: {}]   ;;  %s516_s4 = inlined_call_operand.vmem [shape: f32[16,32], index: 4, kind: output, shape index: {}]  }
   0x1   :  { %v19_v0 = vld [vmem:[%s512_s2] sm:$0xff]  ;;  %v20_v1 = vld [vmem:[%s512_s2 + $0x8] sm:$0xff]  ;;  %v21_v2 = vld [vmem:[%s512_s2 + $0x10] sm:$0xff]  ;;  %419 = vset.pattern.permute.xlu1 %v428_v32  ;;  %420 = vset.pattern.permute.xlu0 %v428_v32 }
   0x2   :  { %v387_v3 = vpack.c.bf16 %v20_v1, %v19_v0  ;;  %v22_v4 = vld [vmem:[%s512_s2 + $0x18] sm:$0xff]  ;;  %v469_v5 = vld [vmem:[%s513_s0] sm:$0xff]  ;;  %v476_v7 = vld [vmem:[%s513_s0 + $0x8] sm:$0xff]  ;;  %s425_s2 = smov 32  }
   0x3   :  { %v391_v6 = vpack.c.bf16 %v22_v4, %v21_v2  ;;  %370 = vmatprep.mubr.msk.f32.mxu0 %vm27_vm0, %v469_v5  ;;  %vm396_vm1 = vmpackc.low %vm27_vm0, %vm27_vm0  ;;  %v24_v24 = vld [vmem:[%s514_s3 + $0x8] sm:$0xff]  ;;  %v23_v25 = vld [vmem:[%s514_s3] sm:$0xff] }
   0x4   :  { %388 = vmatprep.subr.bf16.mxu0 %v387_v3  ;;  %v25_v33 = vld [vmem:[%s515_s1] sm:$0xff]  ;;  %v26_v34 = vld [vmem:[%s515_s1 + $0x8] sm:$0xff] }
   0x5   :  { %390 = vmatpush3.bf16.msra.mxu0 %v387_v3 }
   0x6   :  { %392 = vmatprep.subr.bf16.mxu0 %v391_v6 }
   0x9   :  { %394 = vmatpush3.bf16.msra.mxu0 %v391_v6 }
   0xc   :  { %371 = vmatmul.mubr.msk.f32.vlgmr.msra.gmra.mrb[0].mxu0 %vm27_vm0, %v476_v7 }
  0xdf   :  { %v372_v8 = vpop.f32.mrb[0].mxu0 }
  0xe0   :  { %113 = vrot.lane.b32.xlu1 %v372_v8, %s425_s2  ;;  %v100_v9 = vpop.f32.mrb[1].mxu0 }
  0xe1   :  { %377 = vmatprep.mubr.msk.f32.mxu1 %vm27_vm0, %v100_v9  ;;  %v409_v10 = vpack.i.bf16 %v372_v8, %v100_v9 }
  0xe3   :  { %410 = vrot.lane.b32.xlu0 %v409_v10, %s426_s27 }
  0xe7   :  { %111 = vrot.lane.b32.xlu0 %v100_v9, %s425_s2 }
 0x152   :  { %v114_v11 = vpop.permute.xlu1 %113 }
 0x153   :  { %v118_v12 = vmul.f32 %v114_v11, %v476_v7 }
 0x155   :  { %123 = vrot.lane.b32.xlu0 %v118_v12, %s427_s28  ;;  %v411_v13 = vpop.permute.xlu0 %410 }
 0x156   :  { %v413_v14 = vunpack.i.h.bf16 %v411_v13  ;;  %v412_v15 = vunpack.i.l.bf16 %v411_v13 }
 0x158   :  { %v395_v16 = vpack.c.bf16 %v413_v14, %v412_v15 }
 0x159   :  { %v112_v17 = vpop.permute.xlu0 %111 }
 0x15a   :  { %v117_v18 = vmul.f32 %v112_v17, %v469_v5  ;;  %397 = vmatprep.subr.msk.bf16.mxu1 %vm396_vm1, %v395_v16 }
 0x15b   :  { %400 = vmatpush3.bf16.xpose.msk.msra.mxu1 %vm396_vm1, %v395_v16 }
 0x15c   :  { %121 = vrot.lane.b32.xlu1 %v117_v18, %s427_s28 }
 0x162   :  { %378 = vmatmul.mubr.msk.f32.vlgmr.msra.gmra.mrb[0].mxu1 %vm27_vm0, %v372_v8 }
 0x1c7   :  { %v124_v19 = vpop.permute.xlu0 %123 }
 0x1c8   :  { %v128_v21 = vadd.f32 %v372_v8, %v124_v19 }
 0x1ce   :  { %v122_v20 = vpop.permute.xlu1 %121 }
 0x1cf   :  { %v127_v22 = vadd.f32 %v122_v20, %v100_v9 }
 0x1d1   :  { %v414_v23 = vpack.i.bf16 %v128_v21, %v127_v22 }
 0x235   :  { %v379_v26 = vpop.f32.mrb[0].mxu1 }
 0x236   :  { %v217_v27 = vmul.f32 %v379_v26, %v24_v24  ;;  %v207_v28 = vpop.f32.mrb[1].mxu1 }
 0x237   :  { %v216_v29 = vmul.f32 %v207_v28, %v23_v25 }
 0x238   :  { %v222_v30 = vsel %vm218_vm2, %v217_v27, 0.0 }
 0x239   :  { %223 = vadd.xlane.f32.xlu0 %v222_v30  ;;  %v219_v31 = vsel %vm218_vm2, %v216_v29, 0.0 }
 0x23a   :  { %220 = vadd.xlane.f32.xlu1 %v219_v31 }
 0x24b   :  { %322 = vperm.xlu1 %419, %v25_v33  }
 0x24f   :  { %415 = vrot.lane.b32.xlu0 %v414_v23, %s427_s28  ;;  %327 = vperm.xlu1 %419, %v26_v34  }
 0x2c6   :  { %v224_v35 = vpop.xlane.xlu0 %223 }
 0x2c7   :  { %v226_v36 = vadd.f32 1e-06, %v224_v35  ;;  %v221_v37 = vpop.xlane.xlu1 %220 }
 0x2c8   :  { %v225_v38 = vadd.f32 1e-06, %v221_v37 }
 0x2c9   :  { %421 = vrcp.f32 %v226_v36 }
 0x2ca   :  { %423 = vrcp.f32 %v225_v38  ;;  %v416_v39 = vpop.permute.xlu0 %415 }
 0x2cb   :  { %v418_v40 = vunpack.i.h.bf16 %v416_v39  ;;  %v417_v41 = vunpack.i.l.bf16 %v416_v39  ;;  %v323_v47 = vpop.permute.xlu1 %322 }
 0x2cd   :  { %v401_v42 = vpack.c.bf16 %v418_v40, %v417_v41 }
 0x2cf   :  { %402 = vmatprep.subr.bf16.mxu0 %v401_v42  ;;  %v328_v48 = vpop.permute.xlu1 %327 }
 0x2d0   :  { %404 = vmatpush3.bf16.msra.mxu0 %v401_v42 }
 0x2d3   :  { %v422_v43 = vpop.eup %421 }
 0x2d4   :  { %v424_v44 = vpop.eup %423  ;;  %v230_v46 = vmul.f32 %v422_v43, %v217_v27 }
 0x2d5   :  { %v229_v45 = vmul.f32 %v424_v44, %v216_v29 }
 0x2d7   :  { %384 = vmatprep.mubr.msk.f32.mxu0 %vm218_vm2, %v229_v45 }
 0x2d8   :  { %385 = vmatmul.mubr.msk.f32.vlgmr.msra.gmra.mrb[2].mxu0 %vm218_vm2, %v230_v46 }
 0x3ab   :  { %v386_v49 = vpop.f32.mrb[2].mxu0 }
 0x3ac   :  { %v331_v50 = vmul.f32 %v386_v49, %v328_v48  ;;  %v311_v51 = vpop.f32.mrb[3].mxu0 }
 0x3ad   :  { %v330_v52 = vmul.f32 %v323_v47, %v311_v51 }
 0x3ae   :  { %v333_v53 = vadd.f32 %v331_v50, %v476_v7 }
 0x3af   :  { %v332_v54 = vadd.f32 %v330_v52, %v469_v5 }
 0x3b0   :  { %335 = vst.msk [vmem:[%s516_s4 + $0x8] sm:$0xff] %vm27_vm0, %v333_v53 }
 0x3b1   :  { %334 = vst.msk [vmem:[%s516_s4] sm:$0xff] %vm27_vm0, %v332_v54 }

</bundles_post_ra>
